<compile_context>
chip_gen: v5e
topology: v5e:2x2
jax: 0.10.0
libtpu: 0.0.40
codegen_flags: <defaults>
</compile_context>

<pallas_src>
import math

import jax
import jax.numpy as jnp
from jax.experimental import pallas as pl
from jax.experimental.pallas import tpu as pltpu

_LANE = 128      # lane width (last dim padding)
_SUBLANE = 8     # sublane width (batch padding, gridless path)
_TILE_B = 128    # batch tile when gridding over batch


def _round_up(n: int, m: int) -> int:
    return ((n + m - 1) // m) * m


def _make_fused_mlp_kernel(num_layers: int, matmul_dtype):
    """Kernel computing Linear(+ReLU) x (num_layers-1) -> Linear, all in VMEM."""

    def kernel(*refs):
        x_ref = refs[0]
        o_ref = refs[-1]
        wb_refs = refs[1:-1]  # w0, b0, w1, b1, ...

        h = x_ref[...]  # f32 activations
        for i in range(num_layers):
            # Load each weight right before its dot (bounds live ranges).
            w = wb_refs[2 * i][...]       # (f_in_pad, f_out_pad), matmul_dtype
            b = wb_refs[2 * i + 1][...]   # (1, f_out_pad), f32
            h = jnp.dot(h.astype(matmul_dtype), w,
                        preferred_element_type=jnp.float32) + b
            if i < num_layers - 1:
                h = jnp.maximum(h, 0.0)   # ReLU in f32 on the VPU
        o_ref[...] = h.astype(o_ref.dtype)

    return kernel


def prepare_params(params, matmul_dtype=jnp.bfloat16):
    """One-time host-side prep: transpose to (f_in, f_out), zero-pad to
    128-lane multiples, cast weights to the MXU dtype. Biases stay f32."""
    flat_wb = []
    for w, b in params:
        f_out, f_in = w.shape
        f_in_pad = _round_up(f_in, _LANE)
        f_out_pad = _round_up(f_out, _LANE)
        w_t = jnp.zeros((f_in_pad, f_out_pad), jnp.float32)
        w_t = w_t.at[:f_in, :f_out].set(w.T.astype(jnp.float32))
        b_pad = jnp.zeros((1, f_out_pad), jnp.float32)
        b_pad = b_pad.at[0, :f_out].set(b.astype(jnp.float32))
        flat_wb.append(w_t.astype(matmul_dtype))
        flat_wb.append(b_pad)
    return tuple(flat_wb)


def make_network_forward(params, *, use_bf16_matmul=True):
    """Prepares (and caches) padded weights once and returns a jitted forward
    function x -> out matching the PyTorch module's semantics."""
    matmul_dtype = jnp.bfloat16 if use_bf16_matmul else jnp.float32
    flat_wb = prepare_params(params, matmul_dtype)

    num_layers = len(params)
    out_dim = params[-1][0].shape[0]
    f_in = params[0][0].shape[1]
    f_in_pad = flat_wb[0].shape[0]
    f_out_pad = flat_wb[-2].shape[1]

    # Static VMEM footprint of the resident weights/biases.
    wb_bytes = sum(int(a.size) * a.dtype.itemsize for a in flat_wb)

    @jax.jit
    def forward(x, wb):
        batch = x.shape[0]
        batch_pad = max(_SUBLANE, _round_up(batch, _SUBLANE))
        use_grid = batch_pad >= 2 * _TILE_B
        if use_grid:
            batch_pad = _round_up(batch_pad, _TILE_B)

        # Single fused dispatch: pad -> kernel -> slice.
        x_pad = jnp.pad(x.astype(jnp.float32),
                        ((0, batch_pad - batch), (0, f_in_pad - f_in)))

        kernel = _make_fused_mlp_kernel(num_layers, matmul_dtype)

        # Guard the "everything VMEM-resident" assumption (v7x has 64 MiB
        # physical VMEM, default scoped limits are 16/32 MiB).
        tile_b = _TILE_B if use_grid else batch_pad
        act_bytes = tile_b * (f_in_pad + f_out_pad) * 4
        needed = wb_bytes + 2 * act_bytes  # double-buffered activations
        vmem_limit = None
        if needed + (2 << 20) > (16 << 20):
            vmem_limit = int(min(2 * needed + (4 << 20), 100 << 20))

        if use_grid:
            # Parallel grid over batch: uses both v7x TensorCores and
            # pipelines activation DMA; weights stay resident (index (0, 0)).
            in_specs = [pl.BlockSpec((_TILE_B, f_in_pad), lambda i: (i, 0))]
            for a in wb:
                in_specs.append(pl.BlockSpec(a.shape, lambda i: (0, 0)))
            out_specs = pl.BlockSpec((_TILE_B, f_out_pad), lambda i: (i, 0))
            out_pad = pl.pallas_call(
                kernel,
                out_shape=jax.ShapeDtypeStruct((batch_pad, f_out_pad),
                                               jnp.float32),
                grid=(batch_pad // _TILE_B,),
                in_specs=in_specs,
                out_specs=out_specs,
                compiler_params=pltpu.CompilerParams(
                    dimension_semantics=("parallel",),
                    vmem_limit_bytes=vmem_limit),
            )(x_pad, *wb)
        else:
            vmem_spec = pl.BlockSpec(memory_space=pltpu.MemorySpace.VMEM)
            compiler_params = None
            if vmem_limit is not None:
                compiler_params = pltpu.CompilerParams(
                    vmem_limit_bytes=vmem_limit)
            out_pad = pl.pallas_call(
                kernel,
                out_shape=jax.ShapeDtypeStruct((batch_pad, f_out_pad),
                                               jnp.float32),
                in_specs=[vmem_spec] * (1 + len(wb)),
                out_specs=vmem_spec,
                compiler_params=compiler_params,
            )(x_pad, *wb)

        return out_pad[:batch, :out_dim]

    return lambda x: forward(x, flat_wb)


def init_network_params(key, in_shape, layer_units, critic=False):
    """Deterministic parameter init mirroring the PyTorch module's __init__.

    Non-critic: weights ~ xavier_normal with gain=calculate_gain('tanh')=5/3,
                biases use PyTorch Linear default (uniform in +-1/sqrt(fan_in)).
    Critic:     weights ~ N(0, 0.01), biases ~ N(0, 0.001).
    """
    params = []
    gain = 5.0 / 3.0  # nn.init.calculate_gain('tanh')
    dims = [in_shape] + list(layer_units)
    for i in range(len(layer_units)):
        fan_in, fan_out = dims[i], dims[i + 1]
        key, kw, kb = jax.random.split(key, 3)
        if critic:
            w = 0.01 * jax.random.normal(kw, (fan_out, fan_in), jnp.float32)
            b = 0.001 * jax.random.normal(kb, (fan_out,), jnp.float32)
        else:
            std = gain * math.sqrt(2.0 / (fan_in + fan_out))
            w = std * jax.random.normal(kw, (fan_out, fan_in), jnp.float32)
            bound = 1.0 / math.sqrt(fan_in)
            b = jax.random.uniform(
                kb, (fan_out,), jnp.float32, minval=-bound, maxval=bound
            )
        params.append((w, b))
    return params


def _reference_forward(x, params, matmul_dtype=None):
    """Plain-JAX reference. If matmul_dtype is given, mimics the kernel's
    MXU-operand dtype (f32 accumulation, f32 bias/ReLU)."""
    h = x.astype(jnp.float32)
    for i, (w, b) in enumerate(params):
        if matmul_dtype is None:
            h = h @ w.T + b
        else:
            h = jnp.dot(h.astype(matmul_dtype), w.T.astype(matmul_dtype),
                        preferred_element_type=jnp.float32) + b
        if i < len(params) - 1:
            h = jnp.maximum(h, 0.0)
    return h


if __name__ == "__main__":
    key = jax.random.PRNGKey(0)

    batch = 4
    in_shape = 32
    layer_units = [64, 32, 8]  # two hidden layers + output layer

    key, kx, kp, kxb = jax.random.split(key, 4)
    x = jax.random.normal(kx, (batch, in_shape), jnp.float32)
    params = init_network_params(kp, in_shape, layer_units, critic=False)

    # Weight prep + jit compiled once, reused for every forward call.
    net_forward = make_network_forward(params, use_bf16_matmul=True)

    # --- small batch (gridless path) ------------------------------------
    out = jax.block_until_ready(net_forward(x))
    assert out.shape == (batch, layer_units[-1])

    ref_f32 = _reference_forward(x, params)
    ref_bf16 = _reference_forward(x, params, matmul_dtype=jnp.bfloat16)
    assert jnp.allclose(out, ref_bf16, atol=1e-3, rtol=1e-3)
    assert jnp.allclose(out, ref_f32, atol=1e-1, rtol=5e-2)

    # --- larger batch (parallel grid over batch, v7x dual-TC path) ------
    big_batch = 256
    xb = jax.random.normal(kxb, (big_batch, in_shape), jnp.float32)
    out_b = jax.block_until_ready(net_forward(xb))
    assert out_b.shape == (big_batch, layer_units[-1])
    ref_b = _reference_forward(xb, params, matmul_dtype=jnp.bfloat16)
    assert jnp.allclose(out_b, ref_b, atol=1e-3, rtol=1e-3)

    print("KERNEL_OK")
</pallas_src>

<mosaic_0001>
module attributes {stable_mosaic.version = 11 : i64} {
  func.func @kernel(%arg0: memref<8x128xf32, #tpu.memory_space<vmem>>, %arg1: memref<128x128xbf16, #tpu.memory_space<vmem>>, %arg2: memref<1x128xf32, #tpu.memory_space<vmem>>, %arg3: memref<128x128xbf16, #tpu.memory_space<vmem>>, %arg4: memref<1x128xf32, #tpu.memory_space<vmem>>, %arg5: memref<128x128xbf16, #tpu.memory_space<vmem>>, %arg6: memref<1x128xf32, #tpu.memory_space<vmem>>, %arg7: memref<8x128xf32, #tpu.memory_space<vmem>>) attributes {dimension_semantics = [], scalar_prefetch = 0 : i64, scratch_operands = 0 : i64, tpu.core_type = #tpu.core_type<tc>} {
    %c0 = arith.constant 0 : index
    %c0_0 = arith.constant 0 : index
    %0 = vector.load %arg0[%c0, %c0_0] : memref<8x128xf32, #tpu.memory_space<vmem>>, vector<8x128xf32>
    %c0_1 = arith.constant 0 : index
    %c0_2 = arith.constant 0 : index
    %1 = vector.load %arg1[%c0_1, %c0_2] : memref<128x128xbf16, #tpu.memory_space<vmem>>, vector<128x128xbf16>
    %c0_3 = arith.constant 0 : index
    %c0_4 = arith.constant 0 : index
    %2 = vector.load %arg2[%c0_3, %c0_4] : memref<1x128xf32, #tpu.memory_space<vmem>>, vector<1x128xf32>
    %3 = arith.truncf %0 : vector<8x128xf32> to vector<8x128xbf16>
    %cst = arith.constant dense<0.000000e+00> : vector<8x128xf32>
    %4 = tpu.matmul %3, %1, %cst {dimension_numbers = #tpu.dot_dimension_numbers<[1], [0], [0], [1], [0, 0, 1, 1], [], []>} : vector<8x128xbf16>, vector<128x128xbf16>, vector<8x128xf32> -> vector<8x128xf32>
    %5 = vector.broadcast %2 : vector<1x128xf32> to vector<8x128xf32>
    %6 = arith.addf %4, %5 : vector<8x128xf32>
    %cst_5 = arith.constant 0.000000e+00 : f32
    %7 = vector.broadcast %cst_5 : f32 to vector<8x128xf32>
    %8 = arith.maximumf %6, %7 : vector<8x128xf32>
    %c0_6 = arith.constant 0 : index
    %c0_7 = arith.constant 0 : index
    %9 = vector.load %arg3[%c0_6, %c0_7] : memref<128x128xbf16, #tpu.memory_space<vmem>>, vector<128x128xbf16>
    %c0_8 = arith.constant 0 : index
    %c0_9 = arith.constant 0 : index
    %10 = vector.load %arg4[%c0_8, %c0_9] : memref<1x128xf32, #tpu.memory_space<vmem>>, vector<1x128xf32>
    %11 = arith.truncf %8 : vector<8x128xf32> to vector<8x128xbf16>
    %cst_10 = arith.constant dense<0.000000e+00> : vector<8x128xf32>
    %12 = tpu.matmul %11, %9, %cst_10 {dimension_numbers = #tpu.dot_dimension_numbers<[1], [0], [0], [1], [0, 0, 1, 1], [], []>} : vector<8x128xbf16>, vector<128x128xbf16>, vector<8x128xf32> -> vector<8x128xf32>
    %13 = vector.broadcast %10 : vector<1x128xf32> to vector<8x128xf32>
    %14 = arith.addf %12, %13 : vector<8x128xf32>
    %cst_11 = arith.constant 0.000000e+00 : f32
    %15 = vector.broadcast %cst_11 : f32 to vector<8x128xf32>
    %16 = arith.maximumf %14, %15 : vector<8x128xf32>
    %c0_12 = arith.constant 0 : index
    %c0_13 = arith.constant 0 : index
    %17 = vector.load %arg5[%c0_12, %c0_13] : memref<128x128xbf16, #tpu.memory_space<vmem>>, vector<128x128xbf16>
    %c0_14 = arith.constant 0 : index
    %c0_15 = arith.constant 0 : index
    %18 = vector.load %arg6[%c0_14, %c0_15] : memref<1x128xf32, #tpu.memory_space<vmem>>, vector<1x128xf32>
    %19 = arith.truncf %16 : vector<8x128xf32> to vector<8x128xbf16>
    %cst_16 = arith.constant dense<0.000000e+00> : vector<8x128xf32>
    %20 = tpu.matmul %19, %17, %cst_16 {dimension_numbers = #tpu.dot_dimension_numbers<[1], [0], [0], [1], [0, 0, 1, 1], [], []>} : vector<8x128xbf16>, vector<128x128xbf16>, vector<8x128xf32> -> vector<8x128xf32>
    %21 = vector.broadcast %18 : vector<1x128xf32> to vector<8x128xf32>
    %22 = arith.addf %20, %21 : vector<8x128xf32>
    %c0_17 = arith.constant 0 : index
    %c0_18 = arith.constant 0 : index
    %23 = vector.load %arg7[%c0_17, %c0_18] : memref<8x128xf32, #tpu.memory_space<vmem>>, vector<8x128xf32>
    tpu.vector_store %arg7[%c0_17, %c0_18], %22 {strides = array<i32>} : memref<8x128xf32, #tpu.memory_space<vmem>>, vector<8x128xf32>,
    return
  }
}

</mosaic_0001>

<bundles_post_ra>
// kernel: forward.1
= control target key start
LH: loop header
LB: loop body
LE: loop exit
PB: predicated region body
PF: predicated region fallthrough
CT: control target
= control target key end

     0   :  { %12 = vsyncpa [#allocation3], 0  ;;  %s602_s0 = inlined_call_operand.vmem [shape: f32[8,128], index: 0, kind: input, shape index: {}]   ;;  %s603_s1 = inlined_call_operand.hbm [shape: bf16[128,128], index: 1, kind: input, shape index: {}]   ;;  %s604_s2 = inlined_call_operand.vmem [shape: f32[1,128], index: 2, kind: input, shape index: {}]   ;;  %s605_s3 = inlined_call_operand.hbm [shape: bf16[128,128], index: 3, kind: input, shape index: {}]   ;;  %s606_s4 = inlined_call_operand.vmem [shape: f32[1,128], index: 4, kind: input, shape index: {}]   ;;  %s607_s5 = inlined_call_operand.hbm [shape: bf16[128,128], index: 5, kind: input, shape index: {}]   ;;  %s608_s6 = inlined_call_operand.vmem [shape: f32[1,128], index: 6, kind: input, shape index: {}]   ;;  %s609_s7 = inlined_call_operand.vmem [shape: f32[8,128], index: 7, kind: output, shape index: {}]  }
   0x1   :  { %13 = vsyncpa [#allocation5], 0  ;;  %s35_s26 = sshll.u32 %s605_s3, 4  ;;  %s533_s27 = smov [#allocation4]   ;;  %s36_s26 = int_to_ptr.hbm [resolvable:$true] %s35_s26 }
   0x2   :  { %s37_s28 = sshll.u32 %s533_s27, 4  ;;  %s20_s8 = sshll.u32 %s603_s1, 4  ;;  %s38_s28 = int_to_ptr.vmem [resolvable:$true] %s37_s28  ;;  %s21_s8 = int_to_ptr.hbm [resolvable:$true] %s20_s8 }
   0x3   :  { %s534_s9 = smov 64   ;;  %s535_s10 = smov 4  }
   0x4   :  { %43 = dma.hbm_to_vmem [thread:$0]  %s36_s26, 1024, %s38_s28, [#allocation5], %s534_s9, %s534_s9, %s535_s10  }
   0x5   :  { %s536_s11 = smov [#allocation2]   ;;  %s50_s15 = sshll.u32 %s607_s5, 4  ;;  %s51_s15 = int_to_ptr.hbm [resolvable:$true] %s50_s15 }
   0x6   :  { %s22_s12 = sshll.u32 %s536_s11, 4  ;;  %s537_s3 = smov [#allocation6]   ;;  %s23_s12 = int_to_ptr.vmem [resolvable:$true] %s22_s12 }
   0x7   :  { %28 = dma.hbm_to_vmem [thread:$0]  %s21_s8, 1024, %s23_s12, [#allocation3], %s534_s9, %s534_s9, %s535_s10  }
   0x8   :  { %s52_s16 = sshll.u32 %s537_s3, 4  ;;  %s53_s16 = int_to_ptr.vmem [resolvable:$true] %s52_s16 }
   0x9   :  { %58 = dma.hbm_to_vmem [thread:$0]  %s51_s15, 1024, %s53_s16, [#allocation5], %s534_s9, %s534_s9, %s535_s10  }
   0xa   :  { %529 = dma.done.wait [#allocation3], 1024  }
   0xb   :  { %530 = vsyncadd [#allocation3], 4294966272 }
   0xc   :  { %531 = dma.done.wait [#allocation5], 2048  }
   0xd   :  { %532 = vsyncadd [#allocation5], 4294965248  ;;  %v432_v0 = vld [vmem:[#allocation2 + $0x38] sm:$0xff]  ;;  %v431_v1 = vld [vmem:[#allocation2 + $0x30] sm:$0xff] }
   0xe   :  { %143 = vmatpush.bf16.msra.mxu0 %v432_v0  ;;  %v440_v2 = vld [vmem:[#allocation4 + $0x38] sm:$0xff]  ;;  %v439_v3 = vld [vmem:[#allocation4 + $0x30] sm:$0xff]  ;;  %v430_v4 = vld [vmem:[#allocation2 + $0x28] sm:$0xff] }
   0xf   :  { %226 = vmatpush.bf16.msra.mxu1 %v440_v2  ;;  %v438_v5 = vld [vmem:[#allocation4 + $0x28] sm:$0xff]  ;;  %v429_v6 = vld [vmem:[#allocation2 + $0x20] sm:$0xff]  ;;  %v428_v8 = vld [vmem:[#allocation2 + $0x18] sm:$0xff] }
  0x10   :  { %v437_v7 = vld [vmem:[#allocation4 + $0x20] sm:$0xff]  ;;  %v436_v9 = vld [vmem:[#allocation4 + $0x18] sm:$0xff]  ;;  %v427_v10 = vld [vmem:[#allocation2 + $0x10] sm:$0xff] }
  0x11   :  { %v435_v11 = vld [vmem:[#allocation4 + $0x10] sm:$0xff]  ;;  %v426_v12 = vld [vmem:[#allocation2 + $0x8] sm:$0xff]  ;;  %v425_v13 = vld [vmem:[#allocation2] sm:$0xff] }
  0x12   :  { %144 = vmatpush.bf16.msra.mxu0 %v431_v1  ;;  %v73_v14 = vld [vmem:[%s602_s0] sm:$0xff]  ;;  %v434_v16 = vld [vmem:[#allocation4 + $0x8] sm:$0xff]  ;;  %v448_v18 = vld [vmem:[#allocation6 + $0x38] sm:$0xff] }
  0x13   :  { %227 = vmatpush.bf16.msra.mxu1 %v439_v3  ;;  %v91_v15 = vpack.c.bf16 %v73_v14, %v73_v14  ;;  %v433_v17 = vld [vmem:[#allocation4] sm:$0xff]  ;;  %309 = vmatpush.bf16.msra.mxu2 %v448_v18  ;;  %v447_v19 = vld [vmem:[#allocation6 + $0x30] sm:$0xff]  ;;  %v446_v20 = vld [vmem:[#allocation6 + $0x28] sm:$0xff] }
  0x14   :  { %v445_v21 = vld [vmem:[#allocation6 + $0x20] sm:$0xff]  ;;  %v444_v22 = vld [vmem:[#allocation6 + $0x18] sm:$0xff]  ;;  %v443_v23 = vld [vmem:[#allocation6 + $0x10] sm:$0xff] }
  0x15   :  { %v454_v24 = vld [vmem:[%s604_s2] ss:$0 sm:$0xff]  ;;  %v442_v30 = vld [vmem:[#allocation6 + $0x8] sm:$0xff] }
  0x16   :  { %145 = vmatpush.bf16.msra.mxu0 %v430_v4  ;;  %v441_v31 = vld [vmem:[#allocation6] sm:$0xff] }
  0x17   :  { %228 = vmatpush.bf16.msra.mxu1 %v438_v5  ;;  %310 = vmatpush.bf16.msra.mxu2 %v447_v19  ;;  %v455_v32 = vld [vmem:[%s606_s4] ss:$0 sm:$0xff] }
  0x18   :  { %v456_v38 = vld [vmem:[%s608_s6] ss:$0 sm:$0xff] }
  0x1a   :  { %146 = vmatpush.bf16.msra.mxu0 %v429_v6 }
  0x1b   :  { %229 = vmatpush.bf16.msra.mxu1 %v437_v7  ;;  %311 = vmatpush.bf16.msra.mxu2 %v446_v20 }
  0x1e   :  { %147 = vmatpush.bf16.msra.mxu0 %v428_v8 }
  0x1f   :  { %230 = vmatpush.bf16.msra.mxu1 %v436_v9  ;;  %312 = vmatpush.bf16.msra.mxu2 %v445_v21 }
  0x22   :  { %148 = vmatpush.bf16.msra.mxu0 %v427_v10 }
  0x23   :  { %231 = vmatpush.bf16.msra.mxu1 %v435_v11  ;;  %313 = vmatpush.bf16.msra.mxu2 %v444_v22 }
  0x26   :  { %149 = vmatpush.bf16.msra.mxu0 %v426_v12 }
  0x27   :  { %232 = vmatpush.bf16.msra.mxu1 %v434_v16  ;;  %314 = vmatpush.bf16.msra.mxu2 %v443_v23 }
  0x2a   :  { %150 = vmatpush.bf16.msra.mxu0 %v425_v13 }
  0x2b   :  { %233 = vmatpush.bf16.msra.mxu1 %v433_v17  ;;  %315 = vmatpush.bf16.msra.mxu2 %v442_v30 }
  0x2d   :  { %151 = vmatmul.bf16.vlgmr.msra.gmra.mxu0 %v91_v15 }
  0x2f   :  { %316 = vmatpush.bf16.msra.mxu2 %v441_v31 }
  0xaa   :  { %v152_v25 = vpop.f32.mrf.mxu0 }
  0xab   :  { %v153_v26 = vadd.f32 %v454_v24, %v152_v25 }
  0xad   :  { %v156_v27 = vmax.f32 %v153_v26, 0.0 }
  0xaf   :  { %v174_v28 = vpack.c.bf16 %v156_v27, %v156_v27 }
  0xb1   :  { %234 = vmatmul.bf16.vlgmr.msra.gmra.mxu1 %v174_v28 }
  0xb2   :  { %v154_v29 = vpop.f32.mrf.mxu0 }
 0x12e   :  { %v235_v33 = vpop.f32.mrf.mxu1 }
 0x12f   :  { %v236_v34 = vadd.f32 %v455_v32, %v235_v33 }
 0x131   :  { %v239_v35 = vmax.f32 %v236_v34, 0.0 }
 0x133   :  { %v257_v36 = vpack.c.bf16 %v239_v35, %v239_v35 }
 0x135   :  { %317 = vmatmul.bf16.vlgmr.msra.gmra.mxu2 %v257_v36 }
 0x136   :  { %v237_v37 = vpop.f32.mrf.mxu1 }
 0x1b8   :  { %v318_v39 = vpop.f32.mrf.mxu2 }
 0x1b9   :  { %v319_v40 = vadd.f32 %v456_v38, %v318_v39 }
 0x1bb   :  { %322 = vst [vmem:[%s609_s7] sm:$0xff] %v319_v40 }
 0x1c0   :  { %v320_v41 = vpop.f32.mrf.mxu2 }
 0x1c1   :  { %327 = vsyncpa [#allocation3], 1 }
 0x1c2   :  { %328 = vsyncpa [#allocation5], 1 }

</bundles_post_ra>
